<compile_context>
chip_gen: v5e
topology: v5e:2x2
jax: 0.10.0
libtpu: 0.0.40
codegen_flags: <defaults>
</compile_context>

<pallas_src>
import functools

import jax
import jax.numpy as jnp
from jax.experimental import pallas as pl
from jax.experimental.pallas import tpu as pltpu

LANE = 128
MAX_BLOCK_ROWS = 2048   # 2048 * 128 * 4 B = 1 MiB per f32 input block
NUM_CORES = 2           # leading "parallel" axis (megacore split on v7x)
ACC_SUBLANES = 8        # per-core vector accumulator tile is (8, 128)


def _round_up(x: int, m: int) -> int:
    return ((x + m - 1) // m) * m


def _mse_partial_kernel(c_ref, g_ref, o_ref, *, valid_rows, block_rows,
                        blocks_per_core):
    core = pl.program_id(0)
    j = pl.program_id(1)

    @pl.when(j == 0)
    def _():
        o_ref[...] = jnp.zeros_like(o_ref)

    # cast in-kernel so HBM traffic stays in the input dtype (bf16-friendly)
    d = c_ref[...].astype(jnp.float32) - g_ref[...].astype(jnp.float32)
    sq = d * d

    # Mask rows past the end of the real array (partial last block, or blocks
    # that land entirely past the end on the second core).
    row_start = (core * blocks_per_core + j) * block_rows
    row_idx = row_start + jax.lax.broadcasted_iota(
        jnp.int32, (block_rows, LANE), 0)
    sq = jnp.where(row_idx < valid_rows, sq, 0.0)

    # Pure-VPU accumulation: fold the row axis in vreg-sized (8,128) groups.
    # The single cross-lane/sublane reduction happens once, in the wrapper.
    o_ref[...] += jnp.sum(
        sq.reshape(block_rows // ACC_SUBLANES, ACC_SUBLANES, LANE), axis=0)


def content_loss(C: jax.Array, G: jax.Array) -> jax.Array:
    """MSE loss == torch.nn.functional.mse_loss(C, G) (mean reduction)."""
    assert C.shape == G.shape, "C and G must have the same shape"
    total_n = C.size
    itemsize = jnp.dtype(C.dtype).itemsize

    c_flat = C.reshape(-1)
    g_flat = G.reshape(-1)

    # Only pad when the element count is not lane-aligned (rare for conv
    # feature maps). Identical zero padding contributes 0 to the SSD.
    pad = (-total_n) % LANE
    if pad:
        c_flat = jnp.pad(c_flat, (0, pad))
        g_flat = jnp.pad(g_flat, (0, pad))
    rows = c_flat.size // LANE
    c2 = c_flat.reshape(rows, LANE)   # free reshape (contiguous)
    g2 = g_flat.reshape(rows, LANE)

    # Sublane-packing-aware row multiple: 8 for f32, 16 for bf16, 32 for 8-bit.
    pack = max(1, 4 // itemsize)
    row_mult = ACC_SUBLANES * pack
    block_rows = min(MAX_BLOCK_ROWS, _round_up(rows, row_mult))
    num_blocks = pl.cdiv(rows, block_rows)
    blocks_per_core = pl.cdiv(num_blocks, NUM_CORES)

    kernel = functools.partial(
        _mse_partial_kernel,
        valid_rows=rows,
        block_rows=block_rows,
        blocks_per_core=blocks_per_core,
    )

    in_spec = pl.BlockSpec(
        (block_rows, LANE),
        lambda c, j: (c * blocks_per_core + j, 0),
    )

    partials = pl.pallas_call(
        kernel,
        out_shape=jax.ShapeDtypeStruct(
            (NUM_CORES * ACC_SUBLANES, LANE), jnp.float32),
        grid_spec=pltpu.PrefetchScalarGridSpec(
            num_scalar_prefetch=0,
            grid=(NUM_CORES, blocks_per_core),
            in_specs=[in_spec, in_spec],
            out_specs=pl.BlockSpec(
                (ACC_SUBLANES, LANE), lambda c, j: (c, 0)),
        ),
        compiler_params=pltpu.CompilerParams(
            dimension_semantics=("parallel", "arbitrary"),
        ),
        cost_estimate=pl.CostEstimate(
            flops=3 * total_n,
            transcendentals=0,
            bytes_accessed=2 * total_n * itemsize
            + NUM_CORES * ACC_SUBLANES * LANE * 4,
        ),
    )(c2, g2)

    # Final tiny cross-lane/sublane reduce + mean normalization (16x128 f32).
    return jnp.sum(partials) * (1.0 / total_n)


if __name__ == "__main__":
    key = jax.random.PRNGKey(0)
    k1, k2 = jax.random.split(key)
    # small NCHW feature maps, consistent with conv features in style transfer
    C = jax.random.normal(k1, (2, 4, 16, 16), dtype=jnp.float32)
    G = jax.random.normal(k2, (2, 4, 16, 16), dtype=jnp.float32)

    loss = content_loss(C, G)
    jax.block_until_ready(loss)

    # sanity check against plain-JAX reference
    ref = jnp.mean((C - G) ** 2)
    assert jnp.allclose(loss, ref, rtol=1e-6, atol=1e-6), (loss, ref)

    print("KERNEL_OK")
</pallas_src>

<mosaic_0001>
module attributes {stable_mosaic.version = 11 : i64} {
  func.func @_mse_partial_kernel(%arg0: i32, %arg1: i32, %arg2: memref<16x128xf32, #tpu.memory_space<vmem>>, %arg3: memref<16x128xf32, #tpu.memory_space<vmem>>, %arg4: memref<8x128xf32, #tpu.memory_space<vmem>>) attributes {dimension_semantics = [#tpu.dimension_semantics<parallel>, #tpu.dimension_semantics<arbitrary>], iteration_bounds = array<i64: 2, 1>, scalar_prefetch = 0 : i64, scratch_operands = 0 : i64, tpu.core_type = #tpu.core_type<tc>, window_params = [{transform_indices = @transform_0, window_bounds = array<i64: 16, 128>}, {transform_indices = @transform_1, window_bounds = array<i64: 16, 128>}, {transform_indices = @transform_2, window_bounds = array<i64: 8, 128>}]} {
    %c0_i32 = arith.constant 0 : i32
    %0 = arith.cmpi eq, %arg1, %c0_i32 : i32
    %1 = arith.extui %0 : i1 to i32
    %c0_i32_0 = arith.constant 0 : i32
    %2 = arith.cmpi ne, %1, %c0_i32_0 : i32
    scf.if %2 {
      %cst_10 = arith.constant 0.000000e+00 : f32
      %22 = vector.broadcast %cst_10 : f32 to vector<8x128xf32>
      %c0_11 = arith.constant 0 : index
      %c0_12 = arith.constant 0 : index
      %23 = vector.load %arg4[%c0_11, %c0_12] : memref<8x128xf32, #tpu.memory_space<vmem>>, vector<8x128xf32>
      tpu.vector_store %arg4[%c0_11, %c0_12], %22 {strides = array<i32>} : memref<8x128xf32, #tpu.memory_space<vmem>>, vector<8x128xf32>,
    } else {
    }
    %c0 = arith.constant 0 : index
    %c0_1 = arith.constant 0 : index
    %3 = vector.load %arg2[%c0, %c0_1] : memref<16x128xf32, #tpu.memory_space<vmem>>, vector<16x128xf32>
    %c0_2 = arith.constant 0 : index
    %c0_3 = arith.constant 0 : index
    %4 = vector.load %arg3[%c0_2, %c0_3] : memref<16x128xf32, #tpu.memory_space<vmem>>, vector<16x128xf32>
    %5 = arith.subf %3, %4 : vector<16x128xf32>
    %6 = arith.mulf %5, %5 : vector<16x128xf32>
    %c1_i32 = arith.constant 1 : i32
    %7 = arith.muli %arg0, %c1_i32 : i32
    %8 = arith.addi %7, %arg1 : i32
    %c16_i32 = arith.constant 16 : i32
    %9 = arith.muli %8, %c16_i32 : i32
    %10 = tpu.iota {dimensions = array<i32: 0>} : vector<16x128xi32>
    %11 = vector.broadcast %9 : i32 to vector<16x128xi32>
    %12 = arith.addi %11, %10 : vector<16x128xi32>
    %c16_i32_4 = arith.constant 16 : i32
    %13 = vector.broadcast %c16_i32_4 : i32 to vector<16x128xi32>
    %14 = arith.cmpi slt, %12, %13 : vector<16x128xi32>
    %cst = arith.constant 0.000000e+00 : f32
    %15 = vector.broadcast %cst : f32 to vector<16x128xf32>
    %16 = arith.select %14, %6, %15 : vector<16x128xi1>, vector<16x128xf32>
    %c0_5 = arith.constant 0 : index
    %c0_6 = arith.constant 0 : index
    %17 = vector.load %arg4[%c0_5, %c0_6] : memref<8x128xf32, #tpu.memory_space<vmem>>, vector<8x128xf32>
    %18 = vector.shape_cast %16 : vector<16x128xf32> to vector<2x8x128xf32>
    %cst_7 = arith.constant dense<0.000000e+00> : vector<8x128xf32>
    %19 = vector.multi_reduction <add>, %18, %cst_7 [0] : vector<2x8x128xf32> to vector<8x128xf32>
    %20 = arith.addf %17, %19 : vector<8x128xf32>
    %c0_8 = arith.constant 0 : index
    %c0_9 = arith.constant 0 : index
    %21 = vector.load %arg4[%c0_8, %c0_9] : memref<8x128xf32, #tpu.memory_space<vmem>>, vector<8x128xf32>
    tpu.vector_store %arg4[%c0_8, %c0_9], %20 {strides = array<i32>} : memref<8x128xf32, #tpu.memory_space<vmem>>, vector<8x128xf32>,
    return
  }
  func.func @transform_0(%arg0: i32, %arg1: i32) -> (i32, i32) {
    %c1_i32 = arith.constant 1 : i32
    %0 = arith.muli %arg0, %c1_i32 : i32
    %1 = arith.addi %0, %arg1 : i32
    %c0_i32 = arith.constant 0 : i32
    %c0_i32_0 = arith.constant 0 : i32
    return %1, %c0_i32 : i32, i32
  }
  func.func @transform_1(%arg0: i32, %arg1: i32) -> (i32, i32) {
    %c1_i32 = arith.constant 1 : i32
    %0 = arith.muli %arg0, %c1_i32 : i32
    %1 = arith.addi %0, %arg1 : i32
    %c0_i32 = arith.constant 0 : i32
    %c0_i32_0 = arith.constant 0 : i32
    return %1, %c0_i32 : i32, i32
  }
  func.func @transform_2(%arg0: i32, %arg1: i32) -> (i32, i32) {
    %c0_i32 = arith.constant 0 : i32
    %c0_i32_0 = arith.constant 0 : i32
    return %arg0, %c0_i32 : i32, i32
  }
}

</mosaic_0001>

<bundles_post_ra>
// kernel: tpu_custom_call.1
= control target key start
LH: loop header
LB: loop body
LE: loop exit
PB: predicated region body
PF: predicated region fallthrough
CT: control target
= control target key end

     0   :  { %s801_s0 = inlined_call_operand.hbm [shape: f32[16,128], index: 0, kind: input, shape index: {}]   ;;  %s802_s1 = inlined_call_operand.hbm [shape: f32[16,128], index: 1, kind: input, shape index: {}]   ;;  %s803_s2 = inlined_call_operand.hbm [shape: f32[16,128], index: 2, kind: output, shape index: {}]  }
   0x1   :  { %804 = sst [smem:[#allocation11_spill]] %s801_s0 }
   0x2   :  { %7 = vsyncpa [#allocation3], 0 }
   0x3   :  { %9 = vsyncpa [#allocation3 + $0x1], 0 }
   0x4   :  { %10 = vsyncpa [#allocation6], 0 }
   0x5   :  { %12 = vsyncpa [#allocation6 + $0x1], 0 }
   0x6   :  { %13 = vsyncpa [#allocation4], 0 }
   0x7   :  { %15 = vsyncpa [#allocation4 + $0x1], 0  ;;  %s632_s9 = smov 0   ;;  %s634_s10 = smov 0  }
   0x8   :  { %s636_s11 = smov 0   ;;  %s638_s12 = smov 0  }
   0x9   :  { %s640_s13 = smov 0   ;;  %s642_s14 = smov 0  }
   0xa LB: > { %s376_s15 = sadd.s32 4294967295, %s613_s14   ;;  %s377_s16 = sadd.s32 4294967294, %s613_s14   ;;  %s613_s14 = sphi %s642_s14, %s21_s14   ;;  %s609_s13 = sphi %s640_s13, %s816_s13   ;;  %s605_s12 = sphi %s638_s12, %s815_s12   ;;  %s601_s11 = sphi %s636_s11, %s814_s11   ;;  %s597_s10 = sphi %s634_s10, %s813_s10   ;;  %s593_s9 = sphi %s632_s9, %s812_s9  }
   0xb   : > { %s33_s17 = sadd.s32 1, %s609_s13  ;;  %s42_s18 = sadd.s32 1, %s601_s11 }
   0xc   : > { %p35_p0 = scmp.ge.s32.totalorder %s33_s17, 2  ;;  %p49_p1 = scmp.ne.s32.totalorder %s601_s11, %s597_s10 }
   0xd   : > { %p50_p2 = scmp.eq.s32.totalorder %s613_s14, 0  ;;  %p55_p3 = scmp.ne.s32.totalorder %s597_s10, %s593_s9 }
   0xe   : > { %s818_s17 = smov (%p35_p0, %s33_s17), 0  ;;  %p56_p5 = scmp.eq.s32.totalorder %s376_s15, 0 }
   0xf   : > { %p673_p4 = por %p50_p2, %p49_p1  ;;  %s39_s20 = ssub.s32 %s609_s13, %s818_s17 }
  0x10   : > { %p107_p6 = scmp.eq.s32.totalorder %s376_s15, 1  ;;  %p40_p7 = scmp.eq.s32.totalorder %s39_s20, 0 }
  0x11   : > { %p679_p8 = por %p56_p5, %p55_p3  ;;  %p113_p10 = scmp.eq.s32.totalorder %s377_s16, 1 }
  0x12   : > { %p683_p9 = por %p107_p6, %p49_p1  ;;  %p379_p12 = scmp.ge.s32.totalorder %s613_s14, 2 }
  0x13   : > { %s688_s23 = scalar_select %p40_p7, %s601_s11, %s42_s18  }
  0x14   : > { %p690_p11 = por %p113_p10, %p55_p3  ;;  %p414_p13 = scmp.lt.s32.totalorder %s613_s14, 2 }
  0x15   : > { %s697_s25 = sand.u32 1, %s601_s11   ;;  %s395_s27 = sshll.u32 %s609_s13, 4 }
  0x16   : > { %s380_s26 = sshll.u32 %s697_s25, 4  ;;  %s809_s0 = sld [smem:[#allocation11_spill]] }
  0x17   : > { %s137_s3 = scalar_lea.vmem [#allocation2], %s380_s26  ;;  %p708_p0 = pnand %p414_p13, %p673_p4 }
  0x18   : > { %s146_s4 = sshll.u32 %s137_s3, 4  ;;  %p386_p1 = scmp.ge.s32.totalorder %s613_s14, 1  ;;  %s147_s4 = int_to_ptr.vmem [resolvable:$true] %s146_s4 }
  0x19   : > { %s134_s7 = scalar_lea.sflag [#allocation3], %s697_s25  ;;  %p471_p3 = pneg %p708_p0 }
  0x1c   : > { %s143_s30 = scalar_lea.hbm %s809_s0, %s395_s27  ;;  %s474_s19 = scalar_lea.hbm %s809_s0, 16 }
  0x1d   : > { %s144_s5 = sshll.u32 %s143_s30, 4  ;;  %s145_s5 = int_to_ptr.hbm [resolvable:$true] %s144_s5 }
  0x1e   : > { %s467_s8 = sshra.s32 %s145_s5, 4  ;;  %s468_s8 = int_to_ptr.hbm [resolvable:$true] %s467_s8 }
  0x1f   : > { %s469_s15 = scalar_lea.hbm %s468_s8, 16 }
  0x20   : > { %p470_p2 = scmp.ne.s32.totalorder %s468_s8, %s469_s15  ;;  %p476_p4 = scmp.lt.s32.totalorder %s474_s19, %s469_s15 }
  0x22   : > { %p472_p5 = pnand %p471_p3, %p470_p2 }
  0x24   : > { %p473_p6 = pneg %p472_p5 }
  0x26   : > { %p478_p7 = pnand %p476_p4, %p473_p6 }
  0x28   : > { %481 = shalt.err (!%p478_p7)
}
  0x29   : > { %s615_s20 = smov 128   ;;  %s616_s28 = smov 8  }
  0x2a   : > { %406 = dma.hbm_to_vmem [thread:$0]  (!%p708_p0), %s145_s5, 256, %s147_s4, %s134_s7, %s615_s20, %s615_s20, %s616_s28  }
  0x2b   : > { %p177_p10 = scmp.lt.s32.totalorder %s613_s14, 3  ;;  %s166_s3 = scalar_lea.hbm %s802_s1, %s395_s27 }
  0x2c   : > { %s167_s15 = sshll.u32 %s166_s3, 4  ;;  %s160_s16 = scalar_lea.vmem [#allocation5], %s380_s26  ;;  %s168_s15 = int_to_ptr.hbm [resolvable:$true] %s167_s15 }
  0x2d   : > { %p730_p13 = pnand %p386_p1, %p177_p10  ;;  %s169_s18 = sshll.u32 %s160_s16, 4  ;;  %s170_s18 = int_to_ptr.vmem [resolvable:$true] %s169_s18 }
  0x2e   : > { %s157_s19 = scalar_lea.sflag [#allocation6], %s697_s25  ;;  %s497_s0 = sshra.s32 %s168_s15, 4  ;;  %s498_s0 = int_to_ptr.hbm [resolvable:$true] %s497_s0 }
  0x2f   : > { %s499_s4 = scalar_lea.hbm %s498_s0, 16  ;;  %s504_s7 = scalar_lea.hbm %s802_s1, 16 }
  0x30   : > { %p500_p2 = scmp.ne.s32.totalorder %s498_s0, %s499_s4  ;;  %p506_p1 = scmp.lt.s32.totalorder %s504_s7, %s499_s4 }
  0x32   : > { %p502_p5 = pnand %p500_p2, %p471_p3 }
  0x34   : > { %p503_p6 = pneg %p502_p5 }
  0x36   : > { %p508_p4 = pnand %p506_p1, %p503_p6 }
  0x38   : > { %511 = shalt.err (!%p508_p4)
}
  0x39   : > { %409 = dma.hbm_to_vmem [thread:$0]  (!%p708_p0), %s168_s15, 256, %s170_s18, %s157_s19, %s615_s20, %s615_s20, %s616_s28  }
  0x3a   : > { %181 = sbr.rel (%p730_p13) target bundleno = 82 (0x52), region = 28  ;;  %s748_s0 = sand.u32 (!%p730_p13), 1, %s597_s10  }
  0x3b   : > { %s387_s25 = sshll.u32 (!%p730_p13), %s748_s0, 4  ;;  %s184_s26 = scalar_lea.sflag (!%p730_p13), [#allocation3], %s748_s0 }
  0x3c   : > { %s187_s29 = scalar_lea.vmem (!%p730_p13), [#allocation2], %s387_s25 }
  0x3f   : > { %580 = dma.done.wait (%p679_p8), %s184_s26, 256  }
  0x40   : > { %582 = vsyncadd (%p679_p8), %s184_s26, 4294967040  ;;  %s194_s6 = scalar_lea.sflag [#allocation6], %s748_s0  ;;  %s197_s20 = scalar_lea.vmem [#allocation5], %s387_s25 }
  0x41   : > { %584 = dma.done.wait (%p679_p8), %s194_s6, 256  }
  0x42   : > { %586 = vsyncadd (%p679_p8), %s194_s6, 4294967040  ;;  %s390_s28 = sshll.u32 %s605_s12, 4  ;;  %v243_v0 = vlaneseq  ;;  %s389_s30 = sshll.u32 %s748_s0, 3  ;;  %v233_v6 = vld [vmem:[%s187_s29] sm:$0xff]  ;;  %v234_v7 = vld [vmem:[%s187_s29 + $0x8] sm:$0xff] }
  0x43   : > { %v246_v2 = vstv %s390_s28  ;;  %v235_v8 = vld [vmem:[%s197_s20] sm:$0xff]  ;;  %s392_s3 = sshll.u32 %s605_s12, 3  ;;  %v236_v9 = vld [vmem:[%s197_s20 + $0x8] sm:$0xff]  ;;  %s223_s16 = scalar_lea.vmem [#allocation7], %s389_s30 }
  0x44   : > { %v244_v1 = vshrl.u32 %v243_v0, 7  ;;  %v237_v10 = vsub.f32 %v233_v6, %v235_v8  ;;  %v238_v11 = vsub.f32 %v234_v7, %v236_v9  ;;  %s268_s15 = scalar_lea.hbm %s803_s2, %s392_s3  ;;  %s270_s18 = sshll.u32 %s223_s16, 4  ;;  %s271_s18 = int_to_ptr.vmem [resolvable:$true] %s270_s18 }
  0x45   : > { %s272_s19 = sshll.u32 %s268_s15, 4  ;;  %s258_s12 = scalar_lea.sflag [#allocation4], %s748_s0  ;;  %s273_s19 = int_to_ptr.hbm [resolvable:$true] %s272_s19 }
  0x46   : > { %v245_v3 = vadd.s32 8, %v244_v1  ;;  %v247_v4 = vadd.s32 %v246_v2, %v244_v1  ;;  %v239_v12 = vmul.f32 %v237_v10, %v237_v10  ;;  %v240_v13 = vmul.f32 %v238_v11, %v238_v11  ;;  %s541_s4 = sshra.s32 %s273_s19, 4  ;;  %s547_s25 = scalar_lea.hbm %s803_s2, 16  ;;  %s542_s4 = int_to_ptr.hbm [resolvable:$true] %s541_s4 }
  0x47   : > { %s543_s27 = scalar_lea.hbm %s542_s4, 8  ;;  %p548_p7 = scmp.lt.s32.totalorder %s542_s4, %s803_s2 }
  0x48   : > { %v248_v5 = vadd.s32 %v246_v2, %v245_v3  ;;  %vm249_vm0 = vcmp.lt.s32.totalorder %v247_v4, 16  ;;  %p544_p8 = scmp.ne.s32.totalorder %s542_s4, %s543_s27  ;;  %p549_p10 = scmp.lt.s32.totalorder %s547_s25, %s543_s27 }
  0x49   : > { %v251_v14 = vsel %vm249_vm0, %v239_v12, 0.0 }
  0x4a   : > { %vm250_vm1 = vcmp.lt.s32.totalorder %v248_v5, 16  ;;  %p545_p0 = pnand %p544_p8, %p683_p9  ;;  %p550_p13 = por %p549_p10, %p548_p7 }
  0x4b   : > { %v252_v15 = vsel %vm250_vm1, %v240_v13, 0.0 }
  0x4c   : > { %v254_v16 = vadd.f32 %v252_v15, %v251_v14  ;;  %p546_p3 = pneg %p545_p0 }
  0x4e   : > { %256 = vst [vmem:[%s223_s16] sm:$0xff] %v254_v16  ;;  %p551_p2 = pnand %p550_p13, %p546_p3 }
  0x50   : > { %554 = shalt.err (!%p551_p2)
}
  0x51   : > { %401 = dma.vmem_to_hbm [thread:$0]  (%p683_p9), %s271_s18, 128, %s273_s19, %s258_s12  }
  0x52 PF: > { %s284_s0 = sand.u32 1, %s593_s9   ;;  %p411_p5 = pnand %p379_p12, %p690_p11 }
  0x53   : > { %s285_s6 = scalar_lea.sflag [#allocation4], %s284_s0 }
  0x54   : > { %p412_p6 = pneg %p411_p5 }
  0x56   : > { %588 = dma.done.wait (%p412_p6), %s285_s6, 128  }
  0x57   : > { %590 = vsyncadd (%p412_p6), %s285_s6, 4294967168  ;;  %s21_s14 = sadd.s32 1, %s613_s14   ;;  %s812_s9 = smov %s597_s10 }
  0x58   : > { %p18_p1 = scmp.ge.s32.totalorder %s21_s14, 4   ;;  %s813_s10 = smov %s601_s11 }
  0x59   : > { %s814_s11 = smov %s688_s23  ;;  %s815_s12 = smov %s609_s13 }
  0x5a   : > { %s816_s13 = smov %s818_s17  ;;  %20 = sbr.rel (!%p18_p1) target bundleno = 10 (0xa), region = 90 }
  0x5f   :  { %291 = vsyncpa [#allocation3], 1 }
  0x60   :  { %293 = vsyncpa [#allocation3 + $0x1], 1 }
  0x61   :  { %294 = vsyncpa [#allocation6], 1 }
  0x62   :  { %296 = vsyncpa [#allocation6 + $0x1], 1 }
  0x63   :  { %297 = vsyncpa [#allocation4], 1 }
  0x64   :  { %299 = vsyncpa [#allocation4 + $0x1], 1 }

</bundles_post_ra>
